<compile_context>
chip_gen: v7x
topology: tpu7x:2x2x1
jax: 0.10.0
libtpu: 0.0.40
codegen_flags: <defaults>
</compile_context>

<pallas_src>
import functools

import jax
import jax.numpy as jnp
from jax.experimental import pallas as pl
from jax.experimental.pallas import tpu as pltpu

LANES = 128


def _charbonnier_partial_kernel(eps_sq, x_ref, y_ref, out_ref):
    x = x_ref[...].astype(jnp.float32)
    y = y_ref[...].astype(jnp.float32)
    diff = x - y
    val = jnp.sqrt(diff * diff + jnp.float32(eps_sq))
    # (tile_rows, 128) -> (tile_rows/8, 8, 128) -> sum over groups -> (8, 128).
    # Groups whole (8, 128) vregs, so this is plain VPU vreg adds (no XLU).
    out_ref[...] = jnp.sum(val.reshape(-1, 8, LANES), axis=0)


def _round_up(a, b):
    return ((a + b - 1) // b) * b


def charbonnier_loss(x, y, eps=1e-4):
    assert x.shape == y.shape, "x and y must have the same shape"
    n = x.size
    eps_sq = float(eps) * float(eps)

    xf = x.reshape(-1)
    yf = y.reshape(-1)

    narrow = x.dtype.itemsize <= 2            # bf16 / fp16
    sub = 16 if narrow else 8                 # native sublane group for the dtype
    max_tile_rows = 16384 if narrow else 8192  # 4 MiB f32 / 4 MiB bf16 per input block

    rows = n // LANES                          # number of full 128-lane rows
    total = jnp.float32(0.0)
    main_elems = 0

    if rows >= sub:
        # Tile rows: multiple of the sublane group, capped at max_tile_rows, and
        # clamped so big inputs yield >= ~4 grid steps (feeds both v7x TCs).
        tile_rows = min(max_tile_rows, max(sub, _round_up(pl.cdiv(rows, 4), sub)))
        num_blocks = rows // tile_rows
        main_rows = num_blocks * tile_rows
        main_elems = main_rows * LANES

        if n % LANES == 0:
            # Free reshape (bitcast) of the full flattened array; the grid simply
            # covers only the first `main_rows` rows (always in-bounds).
            x2d = xf.reshape(rows, LANES)
            y2d = yf.reshape(rows, LANES)
        else:
            # Rare case (element count not a multiple of 128): a prefix slice is
            # required to form the 2-D view.  Only the kernel-covered prefix is
            # sliced; the remainder goes through the cheap JAX tail below.
            x2d = xf[:main_elems].reshape(main_rows, LANES)
            y2d = yf[:main_elems].reshape(main_rows, LANES)

        partials = pl.pallas_call(
            functools.partial(_charbonnier_partial_kernel, eps_sq),
            out_shape=jax.ShapeDtypeStruct((num_blocks * 8, LANES), jnp.float32),
            grid_spec=pltpu.PrefetchScalarGridSpec(
                num_scalar_prefetch=0,
                grid=(num_blocks,),
                in_specs=[
                    pl.BlockSpec((tile_rows, LANES), lambda i: (i, 0)),
                    pl.BlockSpec((tile_rows, LANES), lambda i: (i, 0)),
                ],
                out_specs=pl.BlockSpec((8, LANES), lambda i: (i, 0)),
            ),
            compiler_params=pltpu.CompilerParams(
                # Each grid step writes its own partial block -> independent, so
                # the reduction shards across both TensorCores on v7x.
                dimension_semantics=("parallel",),
                # 2 inputs x 2 buffers x 4 MiB = 16 MiB << 32 MiB; safe on v7x's
                # 64 MiB physical VMEM as well.
                vmem_limit_bytes=32 * 1024 * 1024,
            ),
        )(x2d, y2d)

        total = jnp.sum(partials, dtype=jnp.float32)

    if main_elems < n:
        # Tail not covered by the kernel (< one tile, plus any sub-128 remainder):
        # a single fused elementwise+reduce in plain JAX — no padding, no copy.
        xt = xf[main_elems:].astype(jnp.float32)
        yt = yf[main_elems:].astype(jnp.float32)
        dt = xt - yt
        total = total + jnp.sum(jnp.sqrt(dt * dt + jnp.float32(eps_sq)),
                                dtype=jnp.float32)

    return total / jnp.float32(n)


if __name__ == "__main__":
    key = jax.random.PRNGKey(0)
    kx, ky = jax.random.split(key)
    # NCHW like the PyTorch module would receive.
    x = jax.random.normal(kx, (2, 4, 16, 16), dtype=jnp.float32)
    y = jax.random.normal(ky, (2, 4, 16, 16), dtype=jnp.float32)

    loss = charbonnier_loss(x, y, eps=1e-4)
    jax.block_until_ready(loss)

    # Reference (plain JAX), same convention as the PyTorch module:
    # mean(sqrt(diff^2 + eps^2)).
    diff = x - y
    ref = jnp.mean(jnp.sqrt(diff * diff + 1e-4 * 1e-4))
    assert jnp.allclose(loss, ref, rtol=1e-5, atol=1e-6), (loss, ref)

    print("KERNEL_OK")
</pallas_src>

<mosaic_0001>
module attributes {stable_mosaic.version = 11 : i64} {
  func.func @_charbonnier_partial_kernel(%arg0: i32, %arg1: memref<8x128xf32, #tpu.memory_space<vmem>>, %arg2: memref<8x128xf32, #tpu.memory_space<vmem>>, %arg3: memref<8x128xf32, #tpu.memory_space<vmem>>) attributes {dimension_semantics = [#tpu.dimension_semantics<parallel>], iteration_bounds = array<i64: 2>, scalar_prefetch = 0 : i64, scratch_operands = 0 : i64, tpu.core_type = #tpu.core_type<tc>, window_params = [{transform_indices = @transform_0, window_bounds = array<i64: 8, 128>}, {transform_indices = @transform_1, window_bounds = array<i64: 8, 128>}, {transform_indices = @transform_2, window_bounds = array<i64: 8, 128>}]} {
    %c0 = arith.constant 0 : index
    %c0_0 = arith.constant 0 : index
    %0 = vector.load %arg1[%c0, %c0_0] : memref<8x128xf32, #tpu.memory_space<vmem>>, vector<8x128xf32>
    %c0_1 = arith.constant 0 : index
    %c0_2 = arith.constant 0 : index
    %1 = vector.load %arg2[%c0_1, %c0_2] : memref<8x128xf32, #tpu.memory_space<vmem>>, vector<8x128xf32>
    %2 = arith.subf %0, %1 : vector<8x128xf32>
    %3 = arith.mulf %2, %2 : vector<8x128xf32>
    %cst = arith.constant 9.99999993E-9 : f32
    %4 = vector.broadcast %cst : f32 to vector<8x128xf32>
    %5 = arith.addf %3, %4 : vector<8x128xf32>
    %6 = math.sqrt %5 : vector<8x128xf32>
    %7 = vector.shape_cast %6 : vector<8x128xf32> to vector<1x8x128xf32>
    %cst_3 = arith.constant dense<0.000000e+00> : vector<8x128xf32>
    %8 = vector.multi_reduction <add>, %7, %cst_3 [0] : vector<1x8x128xf32> to vector<8x128xf32>
    %c0_4 = arith.constant 0 : index
    %c0_5 = arith.constant 0 : index
    %9 = vector.load %arg3[%c0_4, %c0_5] : memref<8x128xf32, #tpu.memory_space<vmem>>, vector<8x128xf32>
    tpu.vector_store %arg3[%c0_4, %c0_5], %8 {strides = array<i32>} : memref<8x128xf32, #tpu.memory_space<vmem>>, vector<8x128xf32>,
    return
  }
  func.func @transform_0(%arg0: i32) -> (i32, i32) {
    %c0_i32 = arith.constant 0 : i32
    %c0_i32_0 = arith.constant 0 : i32
    return %arg0, %c0_i32 : i32, i32
  }
  func.func @transform_1(%arg0: i32) -> (i32, i32) {
    %c0_i32 = arith.constant 0 : i32
    %c0_i32_0 = arith.constant 0 : i32
    return %arg0, %c0_i32 : i32, i32
  }
  func.func @transform_2(%arg0: i32) -> (i32, i32) {
    %c0_i32 = arith.constant 0 : i32
    %c0_i32_0 = arith.constant 0 : i32
    return %arg0, %c0_i32 : i32, i32
  }
}

</mosaic_0001>

<bundles_post_ra>
// kernel: tpu_custom_call.1
= control target key start
LH: loop header
LB: loop body
LE: loop exit
PB: predicated region body
PF: predicated region fallthrough
CT: control target
= control target key end

     0   :  { %7 = vsyncpa [#allocation3], 0  ;;  %s744_s0 = inlined_call_operand.hbm [shape: f32[16,128], index: 0, kind: input, shape index: {}]   ;;  %s745_s1 = inlined_call_operand.hbm [shape: f32[16,128], index: 1, kind: input, shape index: {}]   ;;  %s746_s2 = inlined_call_operand.hbm [shape: f32[16,128], index: 2, kind: output, shape index: {}]  }
   0x1   :  { %9 = vsyncpa [#allocation3 + $0x1], 0 }
   0x2   :  { %10 = vsyncpa [#allocation6], 0 }
   0x3   :  { %12 = vsyncpa [#allocation6 + $0x1], 0 }
   0x4   :  { %13 = vsyncpa [#allocation4], 0 }
   0x5   :  { %15 = vsyncpa [#allocation4 + $0x1], 0  ;;  %s535_s9 = smov 0   ;;  %s537_s10 = smov 0  }
   0x6   :  { %s539_s11 = smov 0   ;;  %s541_s12 = smov 0  }
   0x7 LB: > { %s556_s13 = sadd.s32 4294967295, %s515_s12   ;;  %s317_s14 = sadd.s32 4294967294, %s515_s12   ;;  %s515_s12 = sphi %s541_s12, %s765_s12   ;;  %s511_s11 = sphi %s539_s11, %s764_s11   ;;  %s507_s10 = sphi %s537_s10, %s763_s10   ;;  %s503_s9 = sphi %s535_s9, %s762_s9  }
   0x8   : > { %s560_s15 = sadd.s32 1, %s515_s12   ;;  %s28_s16 = sadd.s32 1, %s511_s11 }
   0x9   : > { %s25_s17 = ssub.s32 %s515_s12, %s560_s15  ;;  %p35_p0 = scmp.ne.s32.totalorder %s511_s11, %s507_s10 }
   0xa   : > { %p26_p1 = scmp.eq.s32.totalorder %s25_s17, 0  ;;  %p36_p2 = scmp.eq.s32.totalorder %s515_s12, 0 }
   0xb   : > { %p41_p3 = scmp.ne.s32.totalorder %s507_s10, %s503_s9  ;;  %p42_p4 = scmp.eq.s32.totalorder %s556_s13, 0 }
   0xc   : > { %s572_s18 = scalar_select %p26_p1, %s511_s11, %s28_s16  }
   0xd   : > { %p574_p5 = por %p36_p2, %p35_p0  ;;  %p578_p6 = por %p42_p4, %p41_p3 }
   0xe   : > { %p91_p7 = scmp.eq.s32.totalorder %s556_s13, 1  ;;  %p97_p8 = scmp.eq.s32.totalorder %s317_s14, 1 }
   0xf   : > { %s750_s20 = scalar_select %p578_p6, 1, 0 }
  0x10   : > { %p349_p10 = scmp.lt.s32.totalorder %s515_s12, 2  ;;  %p585_p11 = por %p91_p7, %p35_p0 }
  0x11   : > { %p589_p12 = por %p97_p8, %p41_p3  ;;  %s594_s23 = sand.u32 1, %s511_s11  }
  0x12   : > { %s751_s21 = scalar_select %p585_p11, 1, 0 }
  0x13   : > { %s752_s22 = scalar_select %p589_p12, 1, 0 }
  0x14   : > { %s321_s24 = sshll.u32 %s515_s12, 7  ;;  %s320_s25 = sshll.u32 %s594_s23, 3 }
  0x15   : > { %s603_s28 = scalar_lea.hbm %s744_s0, %s321_s24  ;;  %s121_s29 = scalar_lea.vmem [#allocation2], %s320_s25 }
  0x16   : > { %s128_s30 = sshll.u32 %s121_s29, 4  ;;  %p609_p13 = pnand %p349_p10, %p574_p5  ;;  %s613_s30 = int_to_ptr.vmem [resolvable:$true] %s128_s30 }
  0x17   : > { %s118_s4 = scalar_lea.sflag [#allocation3], %s594_s23  ;;  %s385_s5 = scalar_lea.hbm %s603_s28, 128 }
  0x18   : > { %p386_p2 = scmp.ne.s32.totalorder %s603_s28, %s385_s5  ;;  %p387_p3 = pneg %p609_p13 }
  0x19   : > { %s390_s8 = scalar_lea.hbm %s744_s0, 256  ;;  %p391_p5 = scmp.lt.u32.totalorder %s603_s28, %s744_s0 }
  0x1a   : > { %p388_p4 = pnand %p387_p3, %p386_p2  ;;  %p392_p8 = scmp.lt.u32.totalorder %s390_s8, %s385_s5 }
  0x1b   : > { %p394_p9 = scmp.lt.u32.totalorder %s385_s5, %s603_s28 }
  0x1c   : > { %p389_p7 = pneg %p388_p4  ;;  %p393_p10 = por %p392_p8, %p391_p5 }
  0x1e   : > { %p395_p0 = por %p394_p9, %p393_p10 }
  0x20   : > { %p396_p1 = pnand %p395_p0, %p389_p7 }
  0x22   : > { %399 = shalt.err (!%p396_p1)
}
  0x23   : > { %s400_s17 = scalar_lea.vmem %s613_s30, 128  ;;  %s517_s19 = smov [#allocation2]  }
  0x24   : > { %p401_p2 = scmp.ne.s32.totalorder %s613_s30, %s400_s17  ;;  %s405_s26 = sshll.u32 %s517_s19, 4  ;;  %s406_s26 = int_to_ptr.vmem [resolvable:$false] %s405_s26 }
  0x25   : > { %s407_s27 = scalar_lea.vmem %s406_s26, 256  ;;  %p408_p11 = scmp.lt.s32.totalorder %s613_s30, %s406_s26 }
  0x26   : > { %p403_p4 = pnand %p401_p2, %p387_p3  ;;  %p409_p5 = scmp.lt.s32.totalorder %s407_s27, %s400_s17 }
  0x28   : > { %p404_p12 = pneg %p403_p4  ;;  %p410_p8 = por %p409_p5, %p408_p11 }
  0x2a   : > { %p411_p9 = pnand %p410_p8, %p404_p12 }
  0x2c   : > { %414 = shalt.err (!%p411_p9)
}
  0x2d   : > { %341 = dma.hbm_to_vmem [thread:$0]  (!%p609_p13), %s603_s28, 128, %s613_s30, %s118_s4  }
  0x2e   : > { %p754_p0 = scmp.lt.s32.totalorder %s515_s12, 3  ;;  %p755_p1 = scmp.ge.s32.totalorder %s515_s12, 1 }
  0x2f   : > { %s656_s7 = scalar_lea.hbm %s745_s1, %s321_s24  ;;  %s139_s8 = scalar_lea.vmem [#allocation5], %s320_s25 }
  0x30   : > { %p647_p7 = pnand %p755_p1, %p754_p0  ;;  %s146_s14 = sshll.u32 %s139_s8, 4  ;;  %s147_s14 = int_to_ptr.vmem [resolvable:$true] %s146_s14 }
  0x31   : > { %s136_s28 = scalar_lea.sflag [#allocation6], %s594_s23  ;;  %s415_s30 = scalar_lea.hbm %s656_s7, 128 }
  0x32   : > { %s756_s29 = scalar_select %p647_p7, 1, 0 }
  0x33   : > { %p416_p11 = scmp.ne.s32.totalorder %s656_s7, %s415_s30  ;;  %s420_s24 = scalar_lea.hbm %s745_s1, 256 }
  0x34   : > { %p421_p2 = scmp.lt.u32.totalorder %s656_s7, %s745_s1  ;;  %p422_p4 = scmp.lt.u32.totalorder %s420_s24, %s415_s30 }
  0x35   : > { %p418_p12 = pnand %p416_p11, %p387_p3  ;;  %p424_p8 = scmp.lt.u32.totalorder %s415_s30, %s656_s7 }
  0x36   : > { %p423_p5 = por %p422_p4, %p421_p2 }
  0x37   : > { %p419_p10 = pneg %p418_p12 }
  0x38   : > { %p425_p9 = por %p424_p8, %p423_p5 }
  0x3a   : > { %p426_p0 = pnand %p425_p9, %p419_p10 }
  0x3c   : > { %429 = shalt.err (!%p426_p0)
}
  0x3d   : > { %s430_s23 = scalar_lea.vmem %s147_s14, 128  ;;  %s518_s25 = smov [#allocation5]  }
  0x3e   : > { %p431_p1 = scmp.ne.s32.totalorder %s147_s14, %s430_s23  ;;  %s435_s26 = sshll.u32 %s518_s25, 4  ;;  %s436_s26 = int_to_ptr.vmem [resolvable:$false] %s435_s26 }
  0x3f   : > { %s437_s27 = scalar_lea.vmem %s436_s26, 256  ;;  %p438_p6 = scmp.lt.s32.totalorder %s147_s14, %s436_s26 }
  0x40   : > { %p433_p11 = pnand %p431_p1, %p387_p3  ;;  %p439_p7 = scmp.lt.s32.totalorder %s437_s27, %s430_s23 }
  0x42   : > { %p434_p12 = pneg %p433_p11  ;;  %p440_p2 = por %p439_p7, %p438_p6 }
  0x44   : > { %p441_p4 = pnand %p440_p2, %p434_p12 }
  0x46   : > { %444 = shalt.err (!%p441_p4)
}
  0x47   : > { %344 = dma.hbm_to_vmem [thread:$0]  (!%p609_p13), %s656_s7, 128, %s147_s14, %s136_s28  }
  0x48   : > { %p757_p10 = scmp.ne.s32.totalorder %s756_s29, 0 }
  0x49   : > { %s683_s5 = sand.u32 (!%p757_p10), 1, %s507_s10   ;;  %p758_p3 = scmp.ne.s32.totalorder (!%p757_p10), %s750_s20, 0 }
  0x4a   : > { %155 = sbr.rel (%p757_p10) target bundleno = 120 (0x78), region = 28  ;;  %s325_s6 = sshll.u32 (!%p757_p10), %s683_s5, 3 }
  0x4b   : > { %s158_s8 = scalar_lea.sflag (!%p757_p10), [#allocation3], %s683_s5  ;;  %s161_s30 = scalar_lea.vmem (!%p757_p10), [#allocation2], %s325_s6 }
  0x51   : > { %490 = dma.done.wait (%p758_p3), %s158_s8, 128  }
  0x52   : > { %492 = vsyncadd (%p758_p3), %s158_s8, 4294967168  ;;  %s167_s3 = scalar_lea.sflag [#allocation6], %s683_s5  ;;  %s170_s7 = scalar_lea.vmem [#allocation5], %s325_s6 }
  0x53   : > { %494 = dma.done.wait (%p758_p3), %s167_s3, 128  }
  0x54   : > { %496 = vsyncadd (%p758_p3), %s167_s3, 4294967168  ;;  %v196_v0 = vld [vmem:[%s161_s30] sm:$0xff]  ;;  %v197_v1 = vld [vmem:[%s170_s7] sm:$0xff]  ;;  %s195_s29 = scalar_lea.vmem [#allocation7], %s325_s6  ;;  %s329_s28 = sshll.u32 %s556_s13, 7 }
  0x55   : > { %v198_v2 = vsub.f32 %v196_v0, %v197_v1  ;;  %s224_s14 = sshll.u32 %s195_s29, 4  ;;  %s702_s16 = scalar_lea.hbm %s746_s2, %s329_s28  ;;  %s697_s14 = int_to_ptr.vmem [resolvable:$true] %s224_s14 }
  0x56   : > { %s211_s24 = scalar_lea.sflag [#allocation4], %s683_s5  ;;  %s445_s17 = scalar_lea.vmem %s697_s14, 128 }
  0x57   : > { %v199_v3 = vmul.f32 %v198_v2, %v198_v2  ;;  %p446_p6 = scmp.ne.s32.totalorder %s697_s14, %s445_s17  ;;  %p759_p13 = scmp.ne.s32.totalorder %s751_s21, 0 }
  0x58   : > { %s519_s13 = smov [#allocation7]  }
  0x59   : > { %v200_v4 = vadd.f32 1e-08, %v199_v3  ;;  %p447_p7 = pnand %p446_p6, %p759_p13  ;;  %s449_s19 = sshll.u32 %s519_s13, 4  ;;  %s450_s19 = int_to_ptr.vmem [resolvable:$false] %s449_s19 }
  0x5a   : > { %s451_s23 = scalar_lea.vmem %s450_s19, 256  ;;  %p452_p8 = scmp.lt.s32.totalorder %s697_s14, %s450_s19 }
  0x5b   : > { %383 = vrsqrt.f32 %v200_v4  ;;  %vm203_vm0 = vcmp.eq.f32.partialorder %v200_v4, inf  ;;  %v206_v6 = vand.u32 2147483648, %v200_v4  ;;  %vm205_vm1 = vcmp.eq.f32.partialorder %v200_v4, 0.0  ;;  %p448_p5 = pneg %p447_p7  ;;  %p453_p9 = scmp.lt.s32.totalorder %s451_s23, %s445_s17 }
  0x5d   : > { %p454_p0 = por %p453_p9, %p452_p8 }
  0x5f   : > { %p455_p1 = pnand %p454_p0, %p448_p5 }
  0x65   : > { %v384_v5 = vpop.eup %383 }
  0x66   : > { %v202_v7 = vmul.f32 %v384_v5, %v200_v4 }
  0x68   : > { %v204_v8 = vsel %vm203_vm0, %v200_v4, %v202_v7 }
  0x69   : > { %v207_v9 = vsel %vm205_vm1, %v206_v6, %v204_v8 }
  0x6a   : > { %209 = vst [vmem:[%s195_s29] sm:$0xff] %v207_v9 }
  0x6b   : > { %458 = shalt.err (!%p455_p1)
}
  0x6c   : > { %s459_s25 = scalar_lea.hbm %s702_s16, 128  ;;  %s463_s5 = scalar_lea.hbm %s746_s2, 256 }
  0x6d   : > { %p460_p11 = scmp.ne.s32.totalorder %s702_s16, %s459_s25  ;;  %p464_p4 = scmp.lt.u32.totalorder %s702_s16, %s746_s2 }
  0x6e   : > { %p465_p10 = scmp.lt.u32.totalorder %s463_s5, %s459_s25  ;;  %p467_p6 = scmp.lt.u32.totalorder %s459_s25, %s702_s16 }
  0x6f   : > { %p461_p12 = pnand %p460_p11, %p759_p13 }
  0x70   : > { %p466_p3 = por %p465_p10, %p464_p4 }
  0x71   : > { %p462_p2 = pneg %p461_p12 }
  0x72   : > { %p468_p7 = por %p467_p6, %p466_p3 }
  0x74   : > { %p469_p5 = pnand %p468_p7, %p462_p2 }
  0x76   : > { %472 = shalt.err (!%p469_p5)
}
  0x77   : > { %336 = dma.vmem_to_hbm [thread:$0]  (%p759_p13), %s697_s14, 128, %s702_s16, %s211_s24  }
  0x78 PF: > { %s236_s30 = sand.u32 1, %s503_s9   ;;  %p760_p8 = scmp.ne.s32.totalorder %s752_s22, 0 }
  0x79   : > { %p761_p9 = scmp.ge.s32.totalorder %s515_s12, 2  ;;  %s237_s3 = scalar_lea.sflag [#allocation4], %s236_s30 }
  0x7b   : > { %p346_p0 = pnand %p761_p9, %p760_p8 }
  0x7d   : > { %498 = dma.done.wait (!%p346_p0), %s237_s3, 128  }
  0x7e   : > { %500 = vsyncadd (!%p346_p0), %s237_s3, 4294967168  ;;  %p18_p1 = scmp.ge.s32.totalorder %s560_s15, 4   ;;  %s762_s9 = smov %s507_s10 }
  0x7f   : > { %s763_s10 = smov %s511_s11  ;;  %s764_s11 = smov %s572_s18 }
  0x80   : > { %s765_s12 = smov %s560_s15  ;;  %20 = sbr.rel (!%p18_p1) target bundleno = 7 (0x7), region = 86 }
  0x87   :  { %242 = vsyncpa [#allocation3], 1 }
  0x88   :  { %244 = vsyncpa [#allocation3 + $0x1], 1 }
  0x89   :  { %245 = vsyncpa [#allocation6], 1 }
  0x8a   :  { %247 = vsyncpa [#allocation6 + $0x1], 1 }
  0x8b   :  { %248 = vsyncpa [#allocation4], 1 }
  0x8c   :  { %250 = vsyncpa [#allocation4 + $0x1], 1 }

</bundles_post_ra>
